<compile_context>
chip_gen: v7x
topology: tpu7x:2x2x1
jax: 0.10.0
libtpu: 0.0.40
codegen_flags: <defaults>
</compile_context>

<pallas_src>
import functools
import math

import jax
import jax.numpy as jnp
from jax.experimental import pallas as pl
from jax.experimental.pallas import tpu as pltpu


_INV_SQRT2 = 1.0 / math.sqrt(2.0)
_SQRT_2_OVER_PI = math.sqrt(2.0 / math.pi)


def _round_up(x, m):
    return (x + m - 1) // m * m


def _gelu(h, approx):
    h = h.astype(jnp.float32)
    if approx:
        # tanh approximation: transcendental goes to the EUP slot (free-ish).
        return 0.5 * h * (1.0 + jnp.tanh(
            _SQRT_2_OVER_PI * (h + 0.044715 * h * h * h)))
    # Exact erf formulation == torch.nn.GELU() default.
    return 0.5 * h * (1.0 + jax.lax.erf(h * jnp.float32(_INV_SQRT2)))


def _chip_info():
    """(vmem_capacity_bytes, lane_align) for the current TPU, with fallbacks."""
    kind = ""
    try:
        kind = jax.devices()[0].device_kind.lower()
    except Exception:
        pass
    vmem_cap = None
    try:
        vmem_cap = int(pltpu.get_tpu_info().vmem_capacity_bytes)
    except Exception:
        vmem_cap = None
    if not vmem_cap or vmem_cap <= 0:
        if "v7" in kind:
            vmem_cap = 64 << 20
        elif "v5" in kind or "v6" in kind:
            vmem_cap = 128 << 20
        else:
            vmem_cap = 64 << 20            # conservative default
    # v6e/v7x MXUs are 256x256; 128 alignment is native on v5e and always legal.
    lane_align = 256 if ("v6" in kind or "v7" in kind) else 128
    return vmem_cap, lane_align


def _resident_spec(block_shape, index_map):
    """BlockSpec for a weight/bias that is DMA'd once: single-buffered."""
    try:
        return pl.BlockSpec(block_shape, index_map,
                            pipeline_mode=pl.Buffered(1))
    except Exception:
        return pl.BlockSpec(block_shape, index_map)


def _mlp_fused_kernel(*refs, num_layers, mxu_dtype, approx_gelu):
    """Fully-resident path.  refs = (x, w0, b0, ..., w_{L-1}, b_{L-1}, o)."""
    x_ref = refs[0]
    o_ref = refs[-1]
    h = x_ref[...]
    for layer in range(num_layers):
        w_ref = refs[1 + 2 * layer]
        b_ref = refs[2 + 2 * layer]
        if layer > 0:
            h = _gelu(h, approx_gelu)
        h = jnp.dot(h.astype(mxu_dtype), w_ref[...],
                    preferred_element_type=jnp.float32)
        h = h + b_ref[...]                  # (1, N) f32 broadcast
    o_ref[...] = h.astype(o_ref.dtype)


def _mlp_ntile_kernel(*refs, num_layers, mxu_dtype, approx_gelu):
    """Streamed-last-layer path.

    refs = (x, w0, b0, ..., w_{L-1}, b_{L-1}, o, h_scratch).
    Grid = (M tiles, N tiles of the LAST layer).  The hidden activation
    (everything before the last matmul) is computed once per M tile at n == 0
    into VMEM scratch and reused across N tiles.
    """
    x_ref = refs[0]
    w_last = refs[1 + 2 * (num_layers - 1)]
    b_last = refs[2 + 2 * (num_layers - 1)]
    o_ref = refs[-2]
    h_ref = refs[-1]
    n = pl.program_id(1)

    @pl.when(n == 0)
    def _():
        h = x_ref[...].astype(jnp.float32)
        for layer in range(num_layers - 1):
            w_ref = refs[1 + 2 * layer]
            b_ref = refs[2 + 2 * layer]
            if layer > 0:
                h = _gelu(h, approx_gelu)
            h = jnp.dot(h.astype(mxu_dtype), w_ref[...],
                        preferred_element_type=jnp.float32) + b_ref[...]
        h_ref[...] = h.astype(jnp.float32)

    h = h_ref[...]
    if num_layers > 1:
        h = _gelu(h, approx_gelu)
    out = jnp.dot(h.astype(mxu_dtype), w_last[...],
                  preferred_element_type=jnp.float32) + b_last[...]
    o_ref[...] = out.astype(o_ref.dtype)


def mlp_forward(x, params, *, mxu_dtype=jnp.bfloat16, gelu_approx=False,
                _force_ntiles=None):
    """x: (..., in_features); params: [(W (out,in), b (out,)), ...] per nn.Linear."""
    *lead, K = x.shape
    h2d = x.reshape(-1, K)
    M = h2d.shape[0]
    num_layers = len(params)
    N = params[0][0].shape[0]

    vmem_cap, lane_align = _chip_info()
    act_dtype = x.dtype
    act_bytes = jnp.dtype(act_dtype).itemsize
    mxu_bytes = jnp.dtype(mxu_dtype).itemsize
    row_align = 16 if act_bytes == 2 else 8        # bf16 packs 2 rows/sublane

    Kp = _round_up(K, lane_align)                  # padded input feature dim
    Nh = _round_up(N, lane_align)                  # padded hidden/output dim
    M8 = _round_up(max(M, 1), row_align)
    last_in_p = Kp if num_layers == 1 else Nh      # contraction dim of last layer

    # Resident footprint (single-buffered weights in mxu dtype, f32 biases).
    front_bytes = 0
    for li in range(num_layers - 1):
        fin_p = Kp if li == 0 else Nh
        front_bytes += fin_p * Nh * mxu_bytes + Nh * 4
    last_bytes = last_in_p * Nh * mxu_bytes + Nh * 4

    headroom = max(8 << 20, vmem_cap // 8)
    usable = vmem_cap - headroom
    slack = 2 << 20

    def tile_bytes(tm, tn, streamed_last):
        b = 2 * tm * Kp * act_bytes                # x tile, double-buffered
        b += 2 * tm * tn * act_bytes               # out tile, double-buffered
        b += tm * last_in_p * 4                    # f32 hidden scratch / live value
        if streamed_last:
            b += 2 * (last_in_p * tn * mxu_bytes + tn * 4)   # streamed W/b tile
        return b

    def pick_tm(budget, tn, streamed_last):
        tm = 512
        while tm > row_align and tile_bytes(tm, tn, streamed_last) > budget:
            tm //= 2
        if tile_bytes(tm, tn, streamed_last) > budget:
            return None
        return tm

    # ---- Plan: fully-resident simple path vs streamed-last-layer path. ----
    use_ntile = bool(_force_ntiles)
    TN = Nh
    No = Nh
    Ntiles = 1

    simple_budget = usable - (front_bytes + last_bytes) - slack
    TM = pick_tm(simple_budget, Nh, False) if simple_budget > 0 else None

    if TM is None or use_ntile:
        use_ntile = True
        nt = int(_force_ntiles) if _force_ntiles else 2
        while True:
            TN = _round_up(pl.cdiv(Nh, nt), lane_align)
            No = TN * pl.cdiv(Nh, TN)
            budget = usable - front_bytes - slack
            TM = pick_tm(budget, TN, True) if budget > 0 else None
            if TM is not None or TN <= lane_align:
                break
            nt *= 2
        if TM is None:
            # TODO(synk): earlier-layer weights alone exceed VMEM; would also
            #             need K-streaming of the front layers.
            TM = row_align
        Ntiles = pl.cdiv(No, TN)

    # Cap the row tile to the (padded) row count; if that would collapse the
    # "parallel" M axis to one big step, split it so megacore chips get >= 2.
    if M8 <= TM:
        TM = M8 if M8 < 512 else 256
    Mp = _round_up(M8, TM)
    m_tiles = Mp // TM

    # ---- Build padded operands. ----
    xp = jnp.pad(h2d, ((0, Mp - M), (0, Kp - K)))

    inputs = [xp]
    flops = 0
    w_bytes_total = 0
    b_bytes_total = 0
    for li, (w, b) in enumerate(params):
        fin = w.shape[1]
        fin_p = Kp if li == 0 else Nh
        fout_p = No if li == num_layers - 1 else Nh
        wt = jnp.pad(w.T.astype(mxu_dtype), ((0, fin_p - fin), (0, fout_p - N)))
        bp = jnp.pad(b.astype(jnp.float32), (0, fout_p - N)).reshape(1, fout_p)
        inputs += [wt, bp]
        flops += 2 * Mp * fin_p * fout_p
        w_bytes_total += fin_p * fout_p * mxu_bytes
        b_bytes_total += fout_p * 4

    # ---- Specs / grid. ----
    if not use_ntile:
        in_specs = [pl.BlockSpec((TM, Kp), lambda i: (i, 0))]
        for li in range(num_layers):
            fin_p = Kp if li == 0 else Nh
            in_specs += [_resident_spec((fin_p, Nh), lambda i: (0, 0)),
                         _resident_spec((1, Nh), lambda i: (0, 0))]
        out_specs = pl.BlockSpec((TM, No), lambda i: (i, 0))
        grid = (m_tiles,)
        dim_sem = ("parallel",)
        scratch_shapes = []
        kernel = functools.partial(_mlp_fused_kernel, num_layers=num_layers,
                                   mxu_dtype=mxu_dtype, approx_gelu=gelu_approx)
        needed = front_bytes + last_bytes + tile_bytes(TM, Nh, False) + slack
    else:
        in_specs = [pl.BlockSpec((TM, Kp), lambda i, n: (i, 0))]
        for li in range(num_layers - 1):
            fin_p = Kp if li == 0 else Nh
            in_specs += [_resident_spec((fin_p, Nh), lambda i, n: (0, 0)),
                         _resident_spec((1, Nh), lambda i, n: (0, 0))]
        # Last layer streamed along N (double-buffered by default so its DMA
        # overlaps the MXU work of the previous N tile).
        in_specs += [pl.BlockSpec((last_in_p, TN), lambda i, n: (0, n)),
                     pl.BlockSpec((1, TN), lambda i, n: (0, n))]
        out_specs = pl.BlockSpec((TM, TN), lambda i, n: (i, n))
        grid = (m_tiles, Ntiles)
        dim_sem = ("parallel", "arbitrary")
        scratch_shapes = [pltpu.VMEM((TM, last_in_p), jnp.float32)]
        kernel = functools.partial(_mlp_ntile_kernel, num_layers=num_layers,
                                   mxu_dtype=mxu_dtype, approx_gelu=gelu_approx)
        needed = front_bytes + tile_bytes(TM, TN, True) + slack

    vmem_limit = int(min(max(needed, 32 << 20), vmem_cap - (4 << 20)))

    cost = pl.CostEstimate(
        flops=int(flops),
        transcendentals=int((num_layers - 1) * Mp * Nh),
        bytes_accessed=int(Mp * Kp * act_bytes + w_bytes_total + b_bytes_total
                           + Mp * No * act_bytes))

    out = pl.pallas_call(
        kernel,
        out_shape=jax.ShapeDtypeStruct((Mp, No), act_dtype),
        grid_spec=pltpu.PrefetchScalarGridSpec(
            num_scalar_prefetch=0,
            grid=grid,
            in_specs=in_specs,
            out_specs=out_specs,
            scratch_shapes=scratch_shapes,
        ),
        compiler_params=pltpu.CompilerParams(
            dimension_semantics=dim_sem,
            vmem_limit_bytes=vmem_limit),
        cost_estimate=cost,
    )(*inputs)

    return out[:M, :N].reshape(*lead, N)


def init_mlp_params(key, in_features, out_features, num_layers):
    """Deterministic init mirroring nn.Linear shapes: W (out, in), b (out,)."""
    params = []
    dims = [(in_features, out_features)] + \
           [(out_features, out_features)] * (num_layers - 1)
    for (fin, fout) in dims:
        key, kw, kb = jax.random.split(key, 3)
        bound = 1.0 / math.sqrt(fin)
        w = jax.random.uniform(kw, (fout, fin), jnp.float32, -bound, bound)
        b = jax.random.uniform(kb, (fout,), jnp.float32, -bound, bound)
        params.append((w, b))
    return params


def mlp_ref(x, params):
    h = x
    for i, (w, b) in enumerate(params):
        if i > 0:
            h = 0.5 * h * (1.0 + jax.lax.erf(h / jnp.sqrt(2.0)))
        h = h @ w.T + b
    return h


if __name__ == "__main__":
    key = jax.random.PRNGKey(0)
    batch, seq = 2, 8
    in_features, out_features, num_layers = 32, 64, 2

    kx, kp, kp2 = jax.random.split(key, 3)
    x = jax.random.normal(kx, (batch, seq, in_features), jnp.float32)
    params = init_mlp_params(kp, in_features, out_features, num_layers)
    ref = mlp_ref(x, params)

    # Default fast path: bf16 MXU operands, f32 accumulation, resident weights.
    out_bf16 = jax.block_until_ready(mlp_forward(x, params))
    assert out_bf16.shape == (batch, seq, out_features)
    assert jnp.allclose(out_bf16, ref, atol=5e-2, rtol=5e-2), \
        "bf16-MXU path mismatch vs pure-JAX reference"

    # Exact path: f32 MXU operands, exact erf GELU.
    out_f32 = jax.block_until_ready(mlp_forward(x, params, mxu_dtype=jnp.float32))
    assert jnp.allclose(out_f32, ref, atol=1e-4, rtol=1e-4), \
        "f32 path mismatch vs pure-JAX reference"

    # Optional tanh-approx GELU (EUP path, recommended on v6e/v7x).
    out_approx = jax.block_until_ready(mlp_forward(x, params, gelu_approx=True))
    assert jnp.allclose(out_approx, ref, atol=5e-2, rtol=5e-2), \
        "tanh-approx GELU path mismatch vs pure-JAX reference"

    # Exercise the streamed-last-layer (N-tiled) fallback with a wider output
    # so the inner grid axis really has > 1 step.
    out_features2 = 512
    params2 = init_mlp_params(kp2, in_features, out_features2, num_layers)
    ref2 = mlp_ref(x, params2)
    out_nt = jax.block_until_ready(
        mlp_forward(x, params2, mxu_dtype=jnp.float32, _force_ntiles=2))
    assert out_nt.shape == (batch, seq, out_features2)
    assert jnp.allclose(out_nt, ref2, atol=1e-4, rtol=1e-4), \
        "streamed-last-layer path mismatch vs pure-JAX reference"

    print("KERNEL_OK")
</pallas_src>

<mosaic_0001>
module attributes {stable_mosaic.version = 11 : i64} {
  func.func @_mlp_fused_kernel(%arg0: i32, %arg1: memref<16x128xf32, #tpu.memory_space<vmem>>, %arg2: memref<128x128xbf16, #tpu.memory_space<vmem>>, %arg3: memref<1x128xf32, #tpu.memory_space<vmem>>, %arg4: memref<128x128xbf16, #tpu.memory_space<vmem>>, %arg5: memref<1x128xf32, #tpu.memory_space<vmem>>, %arg6: memref<16x128xf32, #tpu.memory_space<vmem>>) attributes {dimension_semantics = [#tpu.dimension_semantics<parallel>], iteration_bounds = array<i64: 1>, scalar_prefetch = 0 : i64, scratch_operands = 0 : i64, tpu.core_type = #tpu.core_type<tc>, window_params = [{transform_indices = @transform_0, window_bounds = array<i64: 16, 128>}, {pipeline_mode = #tpu.pipeline_mode<synchronous>, transform_indices = @transform_1, window_bounds = array<i64: 128, 128>}, {pipeline_mode = #tpu.pipeline_mode<synchronous>, transform_indices = @transform_2, window_bounds = array<i64: 1, 128>}, {pipeline_mode = #tpu.pipeline_mode<synchronous>, transform_indices = @transform_3, window_bounds = array<i64: 128, 128>}, {pipeline_mode = #tpu.pipeline_mode<synchronous>, transform_indices = @transform_4, window_bounds = array<i64: 1, 128>}, {transform_indices = @transform_5, window_bounds = array<i64: 16, 128>}]} {
    %c0 = arith.constant 0 : index
    %c0_0 = arith.constant 0 : index
    %0 = vector.load %arg1[%c0, %c0_0] : memref<16x128xf32, #tpu.memory_space<vmem>>, vector<16x128xf32>
    %1 = arith.truncf %0 : vector<16x128xf32> to vector<16x128xbf16>
    %c0_1 = arith.constant 0 : index
    %c0_2 = arith.constant 0 : index
    %2 = vector.load %arg2[%c0_1, %c0_2] : memref<128x128xbf16, #tpu.memory_space<vmem>>, vector<128x128xbf16>
    %cst = arith.constant dense<0.000000e+00> : vector<16x128xf32>
    %3 = tpu.matmul %1, %2, %cst {dimension_numbers = #tpu.dot_dimension_numbers<[1], [0], [0], [1], [0, 0, 1, 1], [], []>} : vector<16x128xbf16>, vector<128x128xbf16>, vector<16x128xf32> -> vector<16x128xf32>
    %c0_3 = arith.constant 0 : index
    %c0_4 = arith.constant 0 : index
    %4 = vector.load %arg3[%c0_3, %c0_4] : memref<1x128xf32, #tpu.memory_space<vmem>>, vector<1x128xf32>
    %5 = vector.broadcast %4 : vector<1x128xf32> to vector<16x128xf32>
    %6 = arith.addf %3, %5 : vector<16x128xf32>
    %cst_5 = arith.constant 5.000000e-01 : f32
    %7 = vector.broadcast %cst_5 : f32 to vector<16x128xf32>
    %8 = arith.mulf %7, %6 : vector<16x128xf32>
    %cst_6 = arith.constant 0.707106769 : f32
    %9 = vector.broadcast %cst_6 : f32 to vector<16x128xf32>
    %10 = arith.mulf %6, %9 : vector<16x128xf32>
    %11 = math.erf %10 : vector<16x128xf32>
    %cst_7 = arith.constant 1.000000e+00 : f32
    %12 = vector.broadcast %cst_7 : f32 to vector<16x128xf32>
    %13 = arith.addf %12, %11 : vector<16x128xf32>
    %14 = arith.mulf %8, %13 : vector<16x128xf32>
    %15 = arith.truncf %14 : vector<16x128xf32> to vector<16x128xbf16>
    %c0_8 = arith.constant 0 : index
    %c0_9 = arith.constant 0 : index
    %16 = vector.load %arg4[%c0_8, %c0_9] : memref<128x128xbf16, #tpu.memory_space<vmem>>, vector<128x128xbf16>
    %cst_10 = arith.constant dense<0.000000e+00> : vector<16x128xf32>
    %17 = tpu.matmul %15, %16, %cst_10 {dimension_numbers = #tpu.dot_dimension_numbers<[1], [0], [0], [1], [0, 0, 1, 1], [], []>} : vector<16x128xbf16>, vector<128x128xbf16>, vector<16x128xf32> -> vector<16x128xf32>
    %c0_11 = arith.constant 0 : index
    %c0_12 = arith.constant 0 : index
    %18 = vector.load %arg5[%c0_11, %c0_12] : memref<1x128xf32, #tpu.memory_space<vmem>>, vector<1x128xf32>
    %19 = vector.broadcast %18 : vector<1x128xf32> to vector<16x128xf32>
    %20 = arith.addf %17, %19 : vector<16x128xf32>
    %c0_13 = arith.constant 0 : index
    %c0_14 = arith.constant 0 : index
    %21 = vector.load %arg6[%c0_13, %c0_14] : memref<16x128xf32, #tpu.memory_space<vmem>>, vector<16x128xf32>
    tpu.vector_store %arg6[%c0_13, %c0_14], %20 {strides = array<i32>} : memref<16x128xf32, #tpu.memory_space<vmem>>, vector<16x128xf32>,
    return
  }
  func.func @transform_0(%arg0: i32) -> (i32, i32) {
    %c0_i32 = arith.constant 0 : i32
    %c0_i32_0 = arith.constant 0 : i32
    return %arg0, %c0_i32 : i32, i32
  }
  func.func @transform_1(%arg0: i32) -> (i32, i32) {
    %c0_i32 = arith.constant 0 : i32
    %c0_i32_0 = arith.constant 0 : i32
    %c0_i32_1 = arith.constant 0 : i32
    return %c0_i32, %c0_i32_0 : i32, i32
  }
  func.func @transform_2(%arg0: i32) -> (i32, i32) {
    %c0_i32 = arith.constant 0 : i32
    %c0_i32_0 = arith.constant 0 : i32
    %c0_i32_1 = arith.constant 0 : i32
    return %c0_i32, %c0_i32_0 : i32, i32
  }
  func.func @transform_3(%arg0: i32) -> (i32, i32) {
    %c0_i32 = arith.constant 0 : i32
    %c0_i32_0 = arith.constant 0 : i32
    %c0_i32_1 = arith.constant 0 : i32
    return %c0_i32, %c0_i32_0 : i32, i32
  }
  func.func @transform_4(%arg0: i32) -> (i32, i32) {
    %c0_i32 = arith.constant 0 : i32
    %c0_i32_0 = arith.constant 0 : i32
    %c0_i32_1 = arith.constant 0 : i32
    return %c0_i32, %c0_i32_0 : i32, i32
  }
  func.func @transform_5(%arg0: i32) -> (i32, i32) {
    %c0_i32 = arith.constant 0 : i32
    %c0_i32_0 = arith.constant 0 : i32
    return %arg0, %c0_i32 : i32, i32
  }
}

</mosaic_0001>

<bundles_post_ra>
// kernel: tpu_custom_call.1
= control target key start
LH: loop header
LB: loop body
LE: loop exit
PB: predicated region body
PF: predicated region fallthrough
CT: control target
= control target key end

     0   :  { %10 = vsyncpa [#allocation3], 0  ;;  %s627_s0 = inlined_call_operand.hbm [shape: f32[16,128], index: 0, kind: input, shape index: {}]   ;;  %s628_s1 = inlined_call_operand.hbm [shape: bf16[128,128], index: 1, kind: input, shape index: {}]   ;;  %s629_s2 = inlined_call_operand.vmem [shape: f32[1,128], index: 2, kind: input, shape index: {}]   ;;  %s630_s3 = inlined_call_operand.hbm [shape: bf16[128,128], index: 3, kind: input, shape index: {}]   ;;  %s631_s4 = inlined_call_operand.vmem [shape: f32[1,128], index: 4, kind: input, shape index: {}]   ;;  %s632_s5 = inlined_call_operand.hbm [shape: f32[16,128], index: 5, kind: output, shape index: {}]  }
   0x1   :  { %11 = vsyncpa [#allocation6], 0 }
   0x2   :  { %12 = vsyncpa [#allocation4], 0  ;;  %s521_s18 = smov [#allocation5]   ;;  %s427_s22 = scalar_lea.hbm %s628_s1, 1024 }
   0x3   :  { %s30_s19 = sshll.u32 %s521_s18, 4  ;;  %p428_p0 = scmp.ne.s32.totalorder %s628_s1, %s427_s22  ;;  %s31_s19 = int_to_ptr.vmem [resolvable:$true] %s30_s19 }
   0x4   :  { %p431_p1 = scmp.lt.u32.totalorder %s427_s22, %s628_s1 }
   0x6   :  { %p433_p2 = pnand %p431_p1, %p428_p0 }
   0x8   :  { %436 = shalt.err (!%p433_p2)
}
   0x9   :  { %s437_s27 = scalar_lea.vmem %s31_s19, 1024  ;;  %p442_p4 = scmp.lt.s32.totalorder %s31_s19, %s31_s19 }
   0xa   :  { %p438_p3 = scmp.ne.s32.totalorder %s31_s19, %s437_s27  ;;  %p443_p5 = scmp.lt.s32.totalorder %s437_s27, %s437_s27 }
   0xc   :  { %p444_p6 = por %p443_p5, %p442_p4 }
   0xe   :  { %p445_p7 = pnand %p444_p6, %p438_p3 }
  0x10   :  { %448 = shalt.err (!%p445_p7)
}
  0x11   :  { %s522_s28 = smov 64   ;;  %s523_s29 = smov 4  }
  0x12   :  { %36 = dma.hbm_to_vmem [thread:$0]  %s628_s1, 1024, %s31_s19, [#allocation6], %s522_s28, %s522_s28, %s523_s29  }
  0x13   :  { %s524_s7 = smov [#allocation2]   ;;  %s449_s11 = scalar_lea.hbm %s627_s0, 256 }
  0x14   :  { %s18_s8 = sshll.u32 %s524_s7, 4  ;;  %p450_p8 = scmp.ne.s32.totalorder %s627_s0, %s449_s11  ;;  %s19_s8 = int_to_ptr.vmem [resolvable:$true] %s18_s8 }
  0x15   :  { %p453_p9 = scmp.lt.u32.totalorder %s449_s11, %s627_s0 }
  0x17   :  { %p455_p10 = pnand %p453_p9, %p450_p8 }
  0x19   :  { %458 = shalt.err (!%p455_p10)
}
  0x1a   :  { %s459_s16 = scalar_lea.vmem %s19_s8, 256  ;;  %p464_p12 = scmp.lt.s32.totalorder %s19_s8, %s19_s8 }
  0x1b   :  { %p460_p11 = scmp.ne.s32.totalorder %s19_s8, %s459_s16  ;;  %p465_p13 = scmp.lt.s32.totalorder %s459_s16, %s459_s16 }
  0x1d   :  { %p466_p0 = por %p465_p13, %p464_p12 }
  0x1f   :  { %p467_p1 = pnand %p466_p0, %p460_p11 }
  0x21   :  { %470 = shalt.err (!%p467_p1)
}
  0x22   :  { %s525_s1 = smov 128   ;;  %s526_s17 = smov 8  }
  0x23   :  { %24 = dma.hbm_to_vmem [thread:$0]  %s627_s0, 256, %s19_s8, [#allocation3], %s525_s1, %s525_s1, %s526_s17  }
  0x24   :  { %s527_s20 = smov [#allocation7]   ;;  %s471_s24 = scalar_lea.hbm %s630_s3, 1024 }
  0x25   :  { %s44_s21 = sshll.u32 %s527_s20, 4  ;;  %p472_p2 = scmp.ne.s32.totalorder %s630_s3, %s471_s24  ;;  %s45_s21 = int_to_ptr.vmem [resolvable:$true] %s44_s21 }
  0x26   :  { %p475_p3 = scmp.lt.u32.totalorder %s471_s24, %s630_s3 }
  0x28   :  { %p477_p4 = pnand %p475_p3, %p472_p2 }
  0x2a   :  { %480 = shalt.err (!%p477_p4)
}
  0x2b   :  { %s481_s6 = scalar_lea.vmem %s45_s21, 1024  ;;  %p486_p6 = scmp.lt.s32.totalorder %s45_s21, %s45_s21 }
  0x2c   :  { %p482_p5 = scmp.ne.s32.totalorder %s45_s21, %s481_s6  ;;  %p487_p7 = scmp.lt.s32.totalorder %s481_s6, %s481_s6 }
  0x2e   :  { %p488_p8 = por %p487_p7, %p486_p6 }
  0x30   :  { %p489_p9 = pnand %p488_p8, %p482_p5 }
  0x32   :  { %492 = shalt.err (!%p489_p9)
}
  0x33   :  { %50 = dma.hbm_to_vmem [thread:$0]  %s630_s3, 1024, %s45_s21, [#allocation6], %s522_s28, %s522_s28, %s523_s29  }
  0x34   :  { %515 = dma.done.wait [#allocation3], 256  }
  0x35   :  { %516 = vsyncadd [#allocation3], 4294967040 }
  0x36   :  { %517 = dma.done.wait [#allocation6], 2048  }
  0x37   :  { %518 = vsyncadd [#allocation6], 4294965248  ;;  %v528_v0 = vmov 0.0   ;;  %vm529_vm0 = vmmov 0   ;;  %v407_v1 = vld [vmem:[#allocation5] sm:$0xff]   ;;  %v408_v2 = vld [vmem:[#allocation5 + $0x8] sm:$0xff]  }
  0x38   :  { %357 = vmatprep.subr.bf16.mxu0 %v528_v0  ;;  %373 = vmatprep.mubr.msk.bf16.mxu0 %vm529_vm0, %v528_v0  ;;  %v409_v3 = vld [vmem:[#allocation5 + $0x10] sm:$0xff]   ;;  %v415_v4 = vld [vmem:[#allocation7] sm:$0xff]   ;;  %v410_v5 = vld [vmem:[#allocation5 + $0x18] sm:$0xff]   ;;  %s530_s8 = smov [#allocation8]  }
  0x39   :  { %377 = vmatprep.subr.bf16.mxu1 %v528_v0  ;;  %393 = vmatprep.mubr.msk.bf16.mxu1 %vm529_vm0, %v528_v0  ;;  %v416_v6 = vld [vmem:[#allocation7 + $0x8] sm:$0xff]   ;;  %v411_v7 = vld [vmem:[#allocation5 + $0x20] sm:$0xff]   ;;  %v413_v9 = vld [vmem:[#allocation5 + $0x30] sm:$0xff]   ;;  %s308_s9 = sshll.u32 %s530_s8, 4  ;;  %s309_s9 = int_to_ptr.vmem [resolvable:$true] %s308_s9 }
  0x3a   :  { %358 = vmatpush3.bf16.msra.mxu0 %v407_v1  ;;  %378 = vmatpush3.bf16.msra.mxu1 %v415_v4  ;;  %v412_v8 = vld [vmem:[#allocation5 + $0x28] sm:$0xff]   ;;  %v414_v10 = vld [vmem:[#allocation5 + $0x38] sm:$0xff]   ;;  %v63_v11 = vld [vmem:[#allocation2] sm:$0xff]  ;;  %s493_s10 = scalar_lea.vmem %s309_s9, 256  ;;  %p498_p11 = scmp.lt.s32.totalorder %s309_s9, %s309_s9 }
  0x3b   :  { %359 = vmatprep.subr.bf16.mxu0 %v528_v0  ;;  %379 = vmatprep.subr.bf16.mxu1 %v528_v0  ;;  %v64_v12 = vld [vmem:[#allocation2 + $0x8] sm:$0xff]  ;;  %v417_v14 = vld [vmem:[#allocation7 + $0x10] sm:$0xff]   ;;  %v419_v16 = vld [vmem:[#allocation7 + $0x20] sm:$0xff]   ;;  %p494_p10 = scmp.ne.s32.totalorder %s309_s9, %s493_s10  ;;  %p499_p12 = scmp.lt.s32.totalorder %s493_s10, %s493_s10 }
  0x3c   :  { %v65_v13 = vpack.c.bf16 %v64_v12, %v63_v11  ;;  %v418_v15 = vld [vmem:[#allocation7 + $0x18] sm:$0xff]   ;;  %v420_v17 = vld [vmem:[#allocation7 + $0x28] sm:$0xff]   ;;  %v421_v18 = vld [vmem:[#allocation7 + $0x30] sm:$0xff]  }
  0x3d   :  { %v422_v19 = vld [vmem:[#allocation7 + $0x38] sm:$0xff]   ;;  %v321_v20 = vld [vmem:[%s629_s2] ss:$0 sm:$0xff]  ;;  %p500_p13 = por %p499_p12, %p498_p11 }
  0x3e   :  { %360 = vmatpush3.bf16.msra.mxu0 %v408_v2  ;;  %380 = vmatpush3.bf16.msra.mxu1 %v416_v6  ;;  %v330_v38 = vld [vmem:[%s631_s4] ss:$0 sm:$0xff] }
  0x3f   :  { %361 = vmatprep.subr.bf16.mxu0 %v528_v0  ;;  %381 = vmatprep.subr.bf16.mxu1 %v528_v0  ;;  %p501_p0 = pnand %p500_p13, %p494_p10 }
  0x42   :  { %362 = vmatpush3.bf16.msra.mxu0 %v409_v3  ;;  %382 = vmatpush3.bf16.msra.mxu1 %v417_v14 }
  0x43   :  { %363 = vmatprep.subr.bf16.mxu0 %v528_v0  ;;  %383 = vmatprep.subr.bf16.mxu1 %v528_v0 }
  0x46   :  { %364 = vmatpush3.bf16.msra.mxu0 %v410_v5  ;;  %384 = vmatpush3.bf16.msra.mxu1 %v418_v15 }
  0x47   :  { %365 = vmatprep.subr.bf16.mxu0 %v528_v0  ;;  %385 = vmatprep.subr.bf16.mxu1 %v528_v0 }
  0x4a   :  { %366 = vmatpush3.bf16.msra.mxu0 %v411_v7  ;;  %386 = vmatpush3.bf16.msra.mxu1 %v419_v16 }
  0x4b   :  { %367 = vmatprep.subr.bf16.mxu0 %v528_v0  ;;  %387 = vmatprep.subr.bf16.mxu1 %v528_v0 }
  0x4e   :  { %368 = vmatpush3.bf16.msra.mxu0 %v412_v8  ;;  %388 = vmatpush3.bf16.msra.mxu1 %v420_v17 }
  0x4f   :  { %369 = vmatprep.subr.bf16.mxu0 %v528_v0  ;;  %389 = vmatprep.subr.bf16.mxu1 %v528_v0 }
  0x52   :  { %370 = vmatpush3.bf16.msra.mxu0 %v413_v9  ;;  %390 = vmatpush3.bf16.msra.mxu1 %v421_v18 }
  0x53   :  { %371 = vmatprep.subr.bf16.mxu0 %v528_v0  ;;  %391 = vmatprep.subr.bf16.mxu1 %v528_v0 }
  0x56   :  { %372 = vmatpush3.bf16.msra.mxu0 %v414_v10  ;;  %392 = vmatpush3.bf16.msra.mxu1 %v422_v19 }
  0x59   :  { %374 = vmatmul.mubr.bf16.vlgmr.msra.gmra.mrb[0].mxu0 %v65_v13 }
 0x12c   :  { %v171_v21 = vpop.f32.mrb[0].mxu0 }
 0x12d   :  { %v172_v22 = vadd.f32 %v321_v20, %v171_v21  ;;  %v375_v23 = vpop.f32.mrb[1].mxu0 }
 0x12e   :  { %v174_v24 = vpop.f32.mrb[2].mxu0 }
 0x12f   :  { %v180_v25 = vmul.f32 0.70710677, %v172_v22  ;;  %v175_v26 = vadd.f32 %v321_v20, %v174_v24  ;;  %v376_v27 = vpop.f32.mrb[3].mxu0  ;;  %v178_v32 = vmul.f32 0.5, %v172_v22 }
 0x131   :  { %423 = verf.f32 %v180_v25  ;;  %v181_v28 = vmul.f32 0.70710677, %v175_v26  ;;  %v179_v33 = vmul.f32 0.5, %v175_v26 }
 0x133   :  { %425 = verf.f32 %v181_v28 }
 0x13b   :  { %v424_v29 = vpop.eup %423 }
 0x13c   :  { %v184_v30 = vadd.f32 1.0, %v424_v29 }
 0x13d   :  { %v426_v31 = vpop.eup %425 }
 0x13e   :  { %v185_v34 = vadd.f32 1.0, %v426_v31  ;;  %v186_v35 = vmul.f32 %v184_v30, %v178_v32 }
 0x140   :  { %v187_v36 = vmul.f32 %v185_v34, %v179_v33 }
 0x142   :  { %v188_v37 = vpack.c.bf16 %v187_v36, %v186_v35 }
 0x144   :  { %394 = vmatmul.mubr.bf16.vlgmr.msra.gmra.mrb[0].mxu1 %v188_v37 }
 0x217   :  { %v294_v39 = vpop.f32.mrb[0].mxu1 }
 0x218   :  { %v295_v40 = vadd.f32 %v330_v38, %v294_v39  ;;  %v395_v41 = vpop.f32.mrb[1].mxu1 }
 0x219   :  { %v297_v42 = vpop.f32.mrb[2].mxu1 }
 0x21a   :  { %301 = vst [vmem:[#allocation8] sm:$0xff] %v295_v40  ;;  %v298_v43 = vadd.f32 %v330_v38, %v297_v42  ;;  %v396_v44 = vpop.f32.mrb[3].mxu1 }
 0x21c   :  { %302 = vst [vmem:[#allocation8 + $0x8] sm:$0xff] %v298_v43 }
 0x21d   :  { %504 = shalt.err (!%p501_p0)
}
 0x21e   :  { %s505_s12 = scalar_lea.hbm %s632_s5, 256 }
 0x21f   :  { %p506_p1 = scmp.ne.s32.totalorder %s632_s5, %s505_s12  ;;  %p509_p2 = scmp.lt.u32.totalorder %s505_s12, %s632_s5 }
 0x221   :  { %p511_p3 = pnand %p509_p2, %p506_p1 }
 0x223   :  { %514 = shalt.err (!%p511_p3)
}
 0x224   :  { %314 = dma.vmem_to_hbm [thread:$0]  %s309_s9, 256, %s632_s5, [#allocation4], %s525_s1, %s525_s1, %s526_s17  }
 0x225   :  { %519 = dma.done.wait [#allocation4], 256  }
 0x226   :  { %520 = vsyncadd [#allocation4], 4294967040 }
 0x227   :  { %318 = vsyncpa [#allocation3], 1 }
 0x228   :  { %319 = vsyncpa [#allocation6], 1 }
 0x229   :  { %320 = vsyncpa [#allocation4], 1 }

</bundles_post_ra>
